<compile_context>
chip_gen: v5e
topology: v5e:2x2
jax: 0.10.0
libtpu: 0.0.40
codegen_flags: <defaults>
</compile_context>

<pallas_src>
import functools
import math

import jax
import jax.numpy as jnp
from jax.experimental import pallas as pl
from jax.experimental.pallas import tpu as pltpu


def add_layernorm_kernel(x_ref, y_ref, gamma_ref, beta_ref, o_ref, *, eps, inv_c):
    # Fused: add -> single-pass mean/var over the lane axis -> normalize -> affine.
    s = x_ref[...].astype(jnp.float32) + y_ref[...].astype(jnp.float32)

    # Issue both reductions directly from s (no serialized mean->centered->var chain).
    s_sum = jnp.sum(s, axis=-1, keepdims=True)
    s2_sum = jnp.sum(s * s, axis=-1, keepdims=True)
    mean = s_sum * inv_c
    var = jnp.maximum(s2_sum * inv_c - mean * mean, 0.0)
    inv = jax.lax.rsqrt(var + eps)

    # Load affine params once; keep them (1, C) so broadcasting is a sublane broadcast.
    gamma = gamma_ref[...].astype(jnp.float32)
    beta = beta_ref[...].astype(jnp.float32)

    o_ref[...] = ((s - mean) * inv * gamma + beta).astype(o_ref.dtype)


def _round_up(x, m):
    return (x + m - 1) // m * m


def add_layernorm(x, y, gamma, beta, eps=1e-5):
    """x, y: [..., C]; gamma, beta: [C]. Returns LayerNorm(x + y) over the last dim."""
    orig_shape = x.shape
    C = orig_shape[-1]
    rows = math.prod(orig_shape[:-1])

    # Sublane-align the row dimension; tile rows so larger shapes spread over the grid
    # (and, on v7x, over both TensorCores via "parallel" semantics).
    rows_aligned = _round_up(rows, 8)
    block_rows = min(rows_aligned, 512)
    rows_padded = _round_up(rows_aligned, block_rows)

    x2 = x.reshape(rows, C)
    y2 = y.reshape(rows, C)
    pad = rows_padded - rows
    if pad:
        x2 = jnp.pad(x2, ((0, pad), (0, 0)))
        y2 = jnp.pad(y2, ((0, pad), (0, 0)))
    g2 = gamma.reshape(1, C)
    b2 = beta.reshape(1, C)

    out = pl.pallas_call(
        functools.partial(add_layernorm_kernel, eps=eps, inv_c=1.0 / C),
        out_shape=jax.ShapeDtypeStruct((rows_padded, C), x.dtype),
        grid=(rows_padded // block_rows,),
        in_specs=[
            pl.BlockSpec((block_rows, C), lambda i: (i, 0)),
            pl.BlockSpec((block_rows, C), lambda i: (i, 0)),
            pl.BlockSpec((1, C), lambda i: (0, 0)),
            pl.BlockSpec((1, C), lambda i: (0, 0)),
        ],
        out_specs=pl.BlockSpec((block_rows, C), lambda i: (i, 0)),
        input_output_aliases={0: 0},
        compiler_params=pltpu.CompilerParams(
            dimension_semantics=("parallel",),
        ),
    )(x2, y2, g2, b2)

    out = out[:rows]
    return out.reshape(orig_shape)


if __name__ == "__main__":
    key = jax.random.PRNGKey(0)
    k1, k2 = jax.random.split(key)

    B, H, W, C = 1, 7, 7, 768
    x257 = jax.random.normal(k1, (B, H, W, C), dtype=jnp.float32)
    x271 = jax.random.normal(k2, (B, H, W, C), dtype=jnp.float32)

    # LayerNorm params (elementwise_affine=True). PyTorch inits to ones/zeros;
    # use a deterministic non-trivial affine so the path is exercised.
    gamma = 1.0 + 0.01 * jnp.arange(C, dtype=jnp.float32)
    beta = 0.001 * jnp.arange(C, dtype=jnp.float32)

    out = add_layernorm(x257, x271, gamma, beta)
    jax.block_until_ready(out)

    # Reference check in plain JAX (two-pass, matches PyTorch LayerNorm semantics).
    s = x257 + x271
    mean = jnp.mean(s, axis=-1, keepdims=True)
    var = jnp.mean((s - mean) ** 2, axis=-1, keepdims=True)
    ref = (s - mean) * jax.lax.rsqrt(var + 1e-5) * gamma + beta
    assert out.shape == (B, H, W, C)
    assert jnp.allclose(out, ref, atol=1e-4, rtol=1e-4)

    print("KERNEL_OK")
</pallas_src>

<mosaic_0001>
module attributes {stable_mosaic.version = 11 : i64} {
  func.func @add_layernorm_kernel(%arg0: i32, %arg1: memref<56x768xf32, #tpu.memory_space<vmem>>, %arg2: memref<56x768xf32, #tpu.memory_space<vmem>>, %arg3: memref<1x768xf32, #tpu.memory_space<vmem>>, %arg4: memref<1x768xf32, #tpu.memory_space<vmem>>, %arg5: memref<56x768xf32, #tpu.memory_space<vmem>>) attributes {dimension_semantics = [#tpu.dimension_semantics<parallel>], iteration_bounds = array<i64: 1>, scalar_prefetch = 0 : i64, scratch_operands = 0 : i64, tpu.core_type = #tpu.core_type<tc>, window_params = [{transform_indices = @transform_0, window_bounds = array<i64: 56, 768>}, {transform_indices = @transform_1, window_bounds = array<i64: 56, 768>}, {pipeline_mode = #tpu.pipeline_mode<synchronous>, transform_indices = @transform_2, window_bounds = array<i64: 1, 768>}, {pipeline_mode = #tpu.pipeline_mode<synchronous>, transform_indices = @transform_3, window_bounds = array<i64: 1, 768>}, {transform_indices = @transform_4, window_bounds = array<i64: 56, 768>}]} {
    %c0 = arith.constant 0 : index
    %c0_0 = arith.constant 0 : index
    %0 = vector.load %arg1[%c0, %c0_0] : memref<56x768xf32, #tpu.memory_space<vmem>>, vector<56x768xf32>
    %c0_1 = arith.constant 0 : index
    %c0_2 = arith.constant 0 : index
    %1 = vector.load %arg2[%c0_1, %c0_2] : memref<56x768xf32, #tpu.memory_space<vmem>>, vector<56x768xf32>
    %2 = arith.addf %0, %1 : vector<56x768xf32>
    %cst = arith.constant dense<0.000000e+00> : vector<56xf32>
    %3 = vector.multi_reduction <add>, %2, %cst [1] : vector<56x768xf32> to vector<56xf32>
    %4 = vector.shape_cast %3 : vector<56xf32> to vector<56x1xf32>
    %5 = arith.mulf %2, %2 : vector<56x768xf32>
    %cst_3 = arith.constant dense<0.000000e+00> : vector<56xf32>
    %6 = vector.multi_reduction <add>, %5, %cst_3 [1] : vector<56x768xf32> to vector<56xf32>
    %7 = vector.shape_cast %6 : vector<56xf32> to vector<56x1xf32>
    %cst_4 = arith.constant 0.00130208337 : f32
    %8 = vector.broadcast %cst_4 : f32 to vector<56x1xf32>
    %9 = arith.mulf %4, %8 : vector<56x1xf32>
    %cst_5 = arith.constant 0.00130208337 : f32
    %10 = vector.broadcast %cst_5 : f32 to vector<56x1xf32>
    %11 = arith.mulf %7, %10 : vector<56x1xf32>
    %12 = arith.mulf %9, %9 : vector<56x1xf32>
    %13 = arith.subf %11, %12 : vector<56x1xf32>
    %cst_6 = arith.constant 0.000000e+00 : f32
    %14 = vector.broadcast %cst_6 : f32 to vector<56x1xf32>
    %15 = arith.maximumf %13, %14 : vector<56x1xf32>
    %cst_7 = arith.constant 9.99999974E-6 : f32
    %16 = vector.broadcast %cst_7 : f32 to vector<56x1xf32>
    %17 = arith.addf %15, %16 : vector<56x1xf32>
    %18 = math.rsqrt %17 : vector<56x1xf32>
    %c0_8 = arith.constant 0 : index
    %c0_9 = arith.constant 0 : index
    %19 = vector.load %arg3[%c0_8, %c0_9] : memref<1x768xf32, #tpu.memory_space<vmem>>, vector<1x768xf32>
    %c0_10 = arith.constant 0 : index
    %c0_11 = arith.constant 0 : index
    %20 = vector.load %arg4[%c0_10, %c0_11] : memref<1x768xf32, #tpu.memory_space<vmem>>, vector<1x768xf32>
    %21 = vector.broadcast %9 : vector<56x1xf32> to vector<56x768xf32>
    %22 = arith.subf %2, %21 : vector<56x768xf32>
    %23 = vector.broadcast %18 : vector<56x1xf32> to vector<56x768xf32>
    %24 = arith.mulf %22, %23 : vector<56x768xf32>
    %25 = vector.broadcast %19 : vector<1x768xf32> to vector<56x768xf32>
    %26 = arith.mulf %24, %25 : vector<56x768xf32>
    %27 = vector.broadcast %20 : vector<1x768xf32> to vector<56x768xf32>
    %28 = arith.addf %26, %27 : vector<56x768xf32>
    %c0_12 = arith.constant 0 : index
    %c0_13 = arith.constant 0 : index
    %29 = vector.load %arg5[%c0_12, %c0_13] : memref<56x768xf32, #tpu.memory_space<vmem>>, vector<56x768xf32>
    tpu.vector_store %arg5[%c0_12, %c0_13], %28 {strides = array<i32>} : memref<56x768xf32, #tpu.memory_space<vmem>>, vector<56x768xf32>,
    return
  }
  func.func @transform_0(%arg0: i32) -> (i32, i32) {
    %c0_i32 = arith.constant 0 : i32
    %c0_i32_0 = arith.constant 0 : i32
    return %arg0, %c0_i32 : i32, i32
  }
  func.func @transform_1(%arg0: i32) -> (i32, i32) {
    %c0_i32 = arith.constant 0 : i32
    %c0_i32_0 = arith.constant 0 : i32
    return %arg0, %c0_i32 : i32, i32
  }
  func.func @transform_2(%arg0: i32) -> (i32, i32) {
    %c0_i32 = arith.constant 0 : i32
    %c0_i32_0 = arith.constant 0 : i32
    %c0_i32_1 = arith.constant 0 : i32
    return %c0_i32, %c0_i32_0 : i32, i32
  }
  func.func @transform_3(%arg0: i32) -> (i32, i32) {
    %c0_i32 = arith.constant 0 : i32
    %c0_i32_0 = arith.constant 0 : i32
    %c0_i32_1 = arith.constant 0 : i32
    return %c0_i32, %c0_i32_0 : i32, i32
  }
  func.func @transform_4(%arg0: i32) -> (i32, i32) {
    %c0_i32 = arith.constant 0 : i32
    %c0_i32_0 = arith.constant 0 : i32
    return %arg0, %c0_i32 : i32, i32
  }
}

</mosaic_0001>

<bundles_post_ra>
// kernel: tpu_custom_call.1
= control target key start
LH: loop header
LB: loop body
LE: loop exit
PB: predicated region body
PF: predicated region fallthrough
CT: control target
= control target key end

     0   :  { %9 = vsyncpa [#allocation3], 0  ;;  %s1551_s0 = inlined_call_operand.hbm [shape: f32[56,768], index: 0, kind: input, shape index: {}, may-alias: {0,4}]   ;;  %s1552_s1 = inlined_call_operand.vmem [shape: f32[56,768], index: 1, kind: input, shape index: {}]   ;;  %s1553_s2 = inlined_call_operand.vmem [shape: f32[1,768], index: 2, kind: input, shape index: {}]   ;;  %s1554_s3 = inlined_call_operand.vmem [shape: f32[1,768], index: 3, kind: input, shape index: {}]   ;;  %s1555_s4 = inlined_call_operand.hbm [shape: f32[56,768], index: 4, kind: output, shape index: {}, may-alias: {0,4}]  }
   0x1   :  { %10 = vsyncpa [#allocation4], 0  ;;  %s15_s17 = sshll.u32 %s1551_s0, 4  ;;  %s739_s18 = smov [#allocation2]   ;;  %s16_s17 = int_to_ptr.hbm [resolvable:$true] %s15_s17 }
   0x2   :  { %s17_s19 = sshll.u32 %s739_s18, 4  ;;  %s740_s20 = smov 768   ;;  %s18_s19 = int_to_ptr.vmem [resolvable:$true] %s17_s19 }
   0x3   :  { %s741_s21 = smov 48  }
   0x4   :  { %23 = dma.hbm_to_vmem [thread:$0]  %s16_s17, 5376, %s18_s19, [#allocation3], %s740_s20, %s740_s20, %s741_s21  }
   0x5   :  { %735 = dma.done.wait [#allocation3], 5376  }
   0x6   :  { %736 = vsyncadd [#allocation3], 4294961920  ;;  %v58_v0 = vld [vmem:[#allocation2 + $0xc0] sm:$0xff]  ;;  %v59_v1 = vld [vmem:[#allocation2 + $0xc8] sm:$0xff]  ;;  %s656_s9 = sshll.u32 %s1555_s4, 4  ;;  %s657_s9 = int_to_ptr.hbm [resolvable:$true] %s656_s9 }
   0x7   :  { %v60_v2 = vld [vmem:[#allocation2 + $0xd0] sm:$0xff]  ;;  %v61_v3 = vld [vmem:[#allocation2 + $0xd8] sm:$0xff]  ;;  %v100_v4 = vld [vmem:[%s1552_s1 + $0xc0] sm:$0xff] }
   0x8   :  { %v101_v5 = vld [vmem:[%s1552_s1 + $0xc8] sm:$0xff]  ;;  %v102_v6 = vld [vmem:[%s1552_s1 + $0xd0] sm:$0xff]  ;;  %v62_v7 = vld [vmem:[#allocation2 + $0xe0] sm:$0xff]  ;;  %v789_v10 = vadd.f32 %v100_v4, %v58_v0 }
   0x9   :  { %v103_v8 = vld [vmem:[%s1552_s1 + $0xd8] sm:$0xff]  ;;  %v104_v9 = vld [vmem:[%s1552_s1 + $0xe0] sm:$0xff]  ;;  %v791_v11 = vadd.f32 %v101_v5, %v59_v1  ;;  %v793_v12 = vadd.f32 %v102_v6, %v60_v2  ;;  %v63_v13 = vld [vmem:[#allocation2 + $0xe8] sm:$0xff] }
   0xa   :  { %v105_v14 = vld [vmem:[%s1552_s1 + $0xe8] sm:$0xff]  ;;  %v46_v15 = vld [vmem:[#allocation2 + $0x60] sm:$0xff]  ;;  %v48_v17 = vld [vmem:[#allocation2 + $0x70] sm:$0xff]  ;;  %v798_v18 = vadd.f32 %v103_v8, %v61_v3  ;;  %v802_v23 = vadd.f32 %v104_v9, %v62_v7  ;;  %v851_v48 = vmul.f32 %v789_v10, %v789_v10 }
   0xb   :  { %v47_v16 = vld [vmem:[#allocation2 + $0x68] sm:$0xff]  ;;  %v188_v19 = vadd.f32 %v791_v11, %v789_v10  ;;  %v49_v20 = vld [vmem:[#allocation2 + $0x78] sm:$0xff]  ;;  %v50_v21 = vld [vmem:[#allocation2 + $0x80] sm:$0xff]  ;;  %v829_v36 = vadd.f32 %v105_v14, %v63_v13  ;;  %v855_v49 = vmul.f32 %v791_v11, %v791_v11  ;;  %v876_v62 = vmul.f32 %v793_v12, %v793_v12 }
   0xc   :  { %v51_v22 = vld [vmem:[#allocation2 + $0x88] sm:$0xff]  ;;  %v88_v24 = vld [vmem:[%s1552_s1 + $0x60] sm:$0xff]  ;;  %v90_v26 = vld [vmem:[%s1552_s1 + $0x70] sm:$0xff] }
   0xd   :  { %v89_v25 = vld [vmem:[%s1552_s1 + $0x68] sm:$0xff]  ;;  %v189_v27 = vadd.f32 %v188_v19, %v793_v12  ;;  %v91_v28 = vld [vmem:[%s1552_s1 + $0x78] sm:$0xff]  ;;  %v92_v29 = vld [vmem:[%s1552_s1 + $0x80] sm:$0xff]  ;;  %v823_v31 = vadd.f32 %v88_v24, %v46_v15  ;;  %v827_v33 = vadd.f32 %v90_v26, %v48_v17 }
   0xe   :  { %v93_v30 = vld [vmem:[%s1552_s1 + $0x88] sm:$0xff]  ;;  %v825_v32 = vadd.f32 %v89_v25, %v47_v16  ;;  %v34_v34 = vld [vmem:[#allocation2] sm:$0xff]  ;;  %v832_v38 = vadd.f32 %v91_v28, %v49_v20  ;;  %v36_v40 = vld [vmem:[#allocation2 + $0x10] sm:$0xff]  ;;  %v836_v43 = vadd.f32 %v92_v29, %v50_v21 }
   0xf   :  { %1595 = vst [vmem:[#allocation8_spill] sm:$0xff] %v823_v31  ;;  %v35_v35 = vld [vmem:[#allocation2 + $0x8] sm:$0xff]  ;;  %v190_v37 = vadd.f32 %v189_v27, %v798_v18  ;;  %v37_v41 = vld [vmem:[#allocation2 + $0x18] sm:$0xff]  ;;  %v38_v42 = vld [vmem:[#allocation2 + $0x20] sm:$0xff]  ;;  %v838_v44 = vadd.f32 %v93_v30, %v51_v22  ;;  %v880_v63 = vmul.f32 %v823_v31, %v823_v31  ;;  %v909_v17 = vmul.f32 %v827_v33, %v827_v33 }
  0x10   :  { %1596 = vst [vmem:[#allocation9_spill] sm:$0xff] %v825_v32  ;;  %v174_v39 = vadd.f32 %v825_v32, %v823_v31  ;;  %v76_v45 = vld [vmem:[%s1552_s1] sm:$0xff]  ;;  %v77_v46 = vld [vmem:[%s1552_s1 + $0x8] sm:$0xff]  ;;  %v78_v47 = vld [vmem:[%s1552_s1 + $0x10] sm:$0xff]  ;;  %v884_v0 = vmul.f32 %v825_v32, %v825_v32 }
  0x11   :  { %1597 = vst [vmem:[#allocation10_spill] sm:$0xff] %v827_v33  ;;  %v191_v50 = vadd.f32 %v190_v37, %v802_v23  ;;  %v39_v52 = vld [vmem:[#allocation2 + $0x28] sm:$0xff]  ;;  %v79_v53 = vld [vmem:[%s1552_s1 + $0x18] sm:$0xff]  ;;  %v80_v54 = vld [vmem:[%s1552_s1 + $0x20] sm:$0xff]  ;;  %v868_v56 = vadd.f32 %v76_v45, %v34_v34  ;;  %v870_v57 = vadd.f32 %v77_v46, %v35_v35  ;;  %v872_v58 = vadd.f32 %v78_v47, %v36_v40 }
  0x12   :  { %1598 = vst [vmem:[#allocation11_spill] sm:$0xff] %v832_v38  ;;  %v175_v51 = vadd.f32 %v174_v39, %v827_v33  ;;  %v81_v55 = vld [vmem:[%s1552_s1 + $0x28] sm:$0xff]  ;;  %v64_v59 = vld [vmem:[#allocation2 + $0xf0] sm:$0xff]  ;;  %v65_v60 = vld [vmem:[#allocation2 + $0xf8] sm:$0xff]  ;;  %v888_v3 = vadd.f32 %v79_v53, %v37_v41  ;;  %v892_v8 = vadd.f32 %v80_v54, %v38_v42 }
  0x13   :  { %1599 = vst [vmem:[#allocation12_spill] sm:$0xff] %v836_v43  ;;  %v66_v61 = vld [vmem:[#allocation2 + $0x100] sm:$0xff]  ;;  %v192_v1 = vadd.f32 %v191_v50, %v829_v36  ;;  %v160_v4 = vadd.f32 %v870_v57, %v868_v56  ;;  %v67_v5 = vld [vmem:[#allocation2 + $0x108] sm:$0xff]  ;;  %v68_v6 = vld [vmem:[#allocation2 + $0x110] sm:$0xff]  ;;  %v209_v15 = vmul.f32 %v868_v56, %v868_v56  ;;  %v210_v16 = vmul.f32 %v870_v57, %v870_v57 }
  0x14   :  { %1600 = vst [vmem:[#allocation13_spill] sm:$0xff] %v838_v44  ;;  %v176_v2 = vadd.f32 %v175_v51, %v832_v38  ;;  %v69_v7 = vld [vmem:[#allocation2 + $0x118] sm:$0xff]  ;;  %v106_v9 = vld [vmem:[%s1552_s1 + $0xf0] sm:$0xff]  ;;  %v108_v14 = vld [vmem:[%s1552_s1 + $0x100] sm:$0xff]  ;;  %v926_v27 = vadd.f32 %v81_v55, %v39_v52  ;;  %v211_v35 = vmul.f32 %v872_v58, %v872_v58  ;;  %v934_v37 = vmul.f32 %v888_v3, %v888_v3 }
  0x15   :  { %1601 = vst [vmem:[#allocation14_spill] sm:$0xff] %v870_v57  ;;  %v107_v13 = vld [vmem:[%s1552_s1 + $0xf8] sm:$0xff]  ;;  %193 = vadd.xlane.f32.xlu2 %v192_v1  ;;  %v161_v20 = vadd.f32 %v160_v4, %v872_v58  ;;  %v109_v21 = vld [vmem:[%s1552_s1 + $0x108] sm:$0xff]  ;;  %v110_v22 = vld [vmem:[%s1552_s1 + $0x110] sm:$0xff]  ;;  %v922_v25 = vadd.f32 %v106_v9, %v64_v59  ;;  %v928_v28 = vadd.f32 %v108_v14, %v66_v61 }
  0x16   :  { %1602 = vst [vmem:[#allocation15_spill] sm:$0xff] %v872_v58  ;;  %v177_v19 = vadd.f32 %v176_v2, %v836_v43  ;;  %v111_v24 = vld [vmem:[%s1552_s1 + $0x118] sm:$0xff]  ;;  %v924_v26 = vadd.f32 %v107_v13, %v65_v60  ;;  %v52_v29 = vld [vmem:[#allocation2 + $0x90] sm:$0xff]  ;;  %v54_v34 = vld [vmem:[#allocation2 + $0xa0] sm:$0xff]  ;;  %v938_v41 = vadd.f32 %v109_v21, %v67_v5  ;;  %v942_v50 = vadd.f32 %v110_v22, %v68_v6 }
  0x17   :  { %1603 = vst [vmem:[#allocation16_spill] sm:$0xff] %v888_v3  ;;  %v53_v30 = vld [vmem:[#allocation2 + $0x98] sm:$0xff]  ;;  %v162_v40 = vadd.f32 %v161_v20, %v888_v3  ;;  %v55_v45 = vld [vmem:[#allocation2 + $0xa8] sm:$0xff]  ;;  %v56_v46 = vld [vmem:[#allocation2 + $0xb0] sm:$0xff]  ;;  %v944_v51 = vadd.f32 %v111_v24, %v69_v7  ;;  %v957_v55 = vmul.f32 %v892_v8, %v892_v8  ;;  %v251_v59 = vadd.f32 %v210_v16, %v209_v15 }
  0x18   :  { %1604 = vst [vmem:[#allocation17_spill] sm:$0xff] %v892_v8  ;;  %v178_v39 = vadd.f32 %v177_v19, %v838_v44  ;;  %v195_v42 = vadd.f32 %v924_v26, %v922_v25  ;;  %v57_v47 = vld [vmem:[#allocation2 + $0xb8] sm:$0xff]  ;;  %v94_v52 = vld [vmem:[%s1552_s1 + $0x90] sm:$0xff]  ;;  %v96_v54 = vld [vmem:[%s1552_s1 + $0xa0] sm:$0xff]  ;;  %v978_v14 = vmul.f32 %v926_v27, %v926_v27  ;;  %v982_v15 = vmul.f32 %v798_v18, %v798_v18 }
  0x19   :  { %1605 = vst [vmem:[#allocation18_spill] sm:$0xff] %v922_v25  ;;  %v95_v53 = vld [vmem:[%s1552_s1 + $0x98] sm:$0xff]  ;;  %v163_v60 = vadd.f32 %v162_v40, %v892_v8  ;;  %v97_v1 = vld [vmem:[%s1552_s1 + $0xa8] sm:$0xff]  ;;  %v98_v2 = vld [vmem:[%s1552_s1 + $0xb0] sm:$0xff]  ;;  %v970_v5 = vadd.f32 %v94_v52, %v52_v29  ;;  %v974_v7 = vadd.f32 %v96_v54, %v54_v34  ;;  %v986_v16 = vmul.f32 %v802_v23, %v802_v23 }
  0x1a   :  { %1606 = vst [vmem:[#allocation19_spill] sm:$0xff] %v924_v26  ;;  %179 = vadd.xlane.f32.xlu1 %v178_v39  ;;  %v196_v61 = vadd.f32 %v195_v42, %v928_v28  ;;  %v99_v4 = vld [vmem:[%s1552_s1 + $0xb8] sm:$0xff]  ;;  %v972_v6 = vadd.f32 %v95_v53, %v53_v30  ;;  %v40_v9 = vld [vmem:[#allocation2 + $0x30] sm:$0xff]  ;;  %v990_v21 = vadd.f32 %v97_v1, %v55_v45  ;;  %v42_v24 = vld [vmem:[#allocation2 + $0x40] sm:$0xff] }
  0x1b   :  { %1607 = vst [vmem:[#allocation20_spill] sm:$0xff] %v926_v27  ;;  %v41_v13 = vld [vmem:[#allocation2 + $0x38] sm:$0xff]  ;;  %v164_v19 = vadd.f32 %v163_v60, %v926_v27  ;;  %v43_v29 = vld [vmem:[#allocation2 + $0x48] sm:$0xff]  ;;  %v994_v30 = vadd.f32 %v98_v2, %v56_v46  ;;  %v996_v34 = vadd.f32 %v99_v4, %v57_v47  ;;  %v82_v39 = vld [vmem:[%s1552_s1 + $0x30] sm:$0xff]  ;;  %v252_v45 = vadd.f32 %v251_v59, %v211_v35 }
  0x1c   :  { %1608 = vst [vmem:[#allocation21_spill] sm:$0xff] %v928_v28  ;;  %v197_v20 = vadd.f32 %v196_v61, %v938_v41  ;;  %v181_v22 = vadd.f32 %v972_v6, %v970_v5  ;;  %v83_v40 = vld [vmem:[%s1552_s1 + $0x38] sm:$0xff]  ;;  %v84_v42 = vld [vmem:[%s1552_s1 + $0x40] sm:$0xff]  ;;  %v1009_v52 = vmul.f32 %v829_v36, %v829_v36  ;;  %v44_v53 = vld [vmem:[#allocation2 + $0x50] sm:$0xff]  ;;  %v1019_v61 = vadd.f32 %v82_v39, %v40_v9 }
  0x1d   :  { %1609 = vst [vmem:[#allocation22_spill] sm:$0xff] %v938_v41  ;;  %165 = vadd.xlane.f32.xlu0 %v164_v19  ;;  %v85_v54 = vld [vmem:[%s1552_s1 + $0x48] sm:$0xff]  ;;  %v86_v60 = vld [vmem:[%s1552_s1 + $0x50] sm:$0xff]  ;;  %v1021_v35 = vadd.f32 %v83_v40, %v41_v13  ;;  %v45_v59 = vld [vmem:[#allocation2 + $0x58] sm:$0xff]  ;;  %v1026_v2 = vadd.f32 %v84_v42, %v42_v24  ;;  %v279_v19 = vadd.f32 %v855_v49, %v851_v48 }
  0x1e   :  { %1610 = vst [vmem:[#allocation23_spill] sm:$0xff] %v942_v50  ;;  %v198_v46 = vadd.f32 %v197_v20, %v942_v50  ;;  %v182_v47 = vadd.f32 %v181_v22, %v974_v7  ;;  %v87_v1 = vld [vmem:[%s1552_s1 + $0x58] sm:$0xff]  ;;  %v1028_v4 = vadd.f32 %v85_v54, %v43_v29  ;;  %v227_v20 = vmul.f32 %v970_v5, %v970_v5  ;;  %v70_v24 = vld [vmem:[#allocation2 + $0x120] sm:$0xff]  ;;  %v71_v40 = vld [vmem:[#allocation2 + $0x128] sm:$0xff] }
  0x1f   :  { %1611 = vst [vmem:[#allocation24_spill] sm:$0xff] %v944_v51  ;;  %v167_v22 = vadd.f32 %v1021_v35, %v1019_v61  ;;  %v215_v39 = vmul.f32 %v1019_v61, %v1019_v61  ;;  %v72_v29 = vld [vmem:[#allocation2 + $0x130] sm:$0xff]  ;;  %v1040_v42 = vadd.f32 %v86_v60, %v44_v53  ;;  %v216_v48 = vmul.f32 %v1021_v35, %v1021_v35  ;;  %v73_v27 = vld [vmem:[#allocation2 + $0x138] sm:$0xff]  ;;  %v74_v58 = vld [vmem:[#allocation2 + $0x140] sm:$0xff] }
  0x20   :  { %1612 = vst [vmem:[#allocation25_spill] sm:$0xff] %v970_v5  ;;  %v199_v9 = vadd.f32 %v198_v46, %v944_v51  ;;  %v183_v13 = vadd.f32 %v182_v47, %v990_v21  ;;  %v217_v49 = vmul.f32 %v1026_v2, %v1026_v2  ;;  %v112_v46 = vld [vmem:[%s1552_s1 + $0x120] sm:$0xff]  ;;  %v113_v47 = vld [vmem:[%s1552_s1 + $0x128] sm:$0xff]  ;;  %v114_v54 = vld [vmem:[%s1552_s1 + $0x130] sm:$0xff]  ;;  %v228_v53 = vmul.f32 %v972_v6, %v972_v6 }
  0x21   :  { %1613 = vst [vmem:[#allocation26_spill] sm:$0xff] %v972_v6  ;;  %v253_v5 = vadd.f32 %v252_v45, %v934_v37  ;;  %v115_v8 = vld [vmem:[%s1552_s1 + $0x138] sm:$0xff]  ;;  %v258_v3 = vadd.f32 %v216_v48, %v215_v39  ;;  %v1065_v57 = vadd.f32 %v112_v46, %v70_v24  ;;  %v1067_v6 = vadd.f32 %v113_v47, %v71_v40  ;;  %v75_v45 = vld [vmem:[#allocation2 + $0x148] sm:$0xff]  ;;  %v116_v39 = vld [vmem:[%s1552_s1 + $0x140] sm:$0xff] }
  0x22   :  { %1614 = vst [vmem:[#allocation27_spill] sm:$0xff] %v974_v7  ;;  %200 = vadd.xlane.f32.xlu2 %v199_v9  ;;  %v184_v60 = vadd.f32 %v183_v13, %v994_v30  ;;  %v1069_v9 = vadd.f32 %v114_v54, %v72_v29  ;;  %v117_v24 = vld [vmem:[%s1552_s1 + $0x148] sm:$0xff]  ;;  %v219_v40 = vmul.f32 %v1040_v42, %v1040_v42 }
  0x23   :  { %1615 = vst [vmem:[#allocation28_spill] sm:$0xff] %v990_v21  ;;  %v254_v37 = vadd.f32 %v253_v5, %v957_v55  ;;  %v259_v29 = vadd.f32 %v258_v3, %v217_v49  ;;  %v1084_v48 = vadd.f32 %v115_v8, %v73_v27  ;;  %v1094_v47 = vadd.f32 %v116_v39, %v74_v58 }
  0x24   :  { %1616 = vst [vmem:[#allocation29_spill] sm:$0xff] %v994_v30  ;;  %v185_v13 = vadd.f32 %v184_v60, %v996_v34  ;;  %v1096_v3 = vadd.f32 %v117_v24, %v75_v45  ;;  %v272_v54 = vadd.f32 %v228_v53, %v227_v20  ;;  %v231_v58 = vmul.f32 %v994_v30, %v994_v30 }
  0x25   :  { %1617 = vst [vmem:[#allocation30_spill] sm:$0xff] %v996_v34  ;;  %v255_v49 = vadd.f32 %v254_v37, %v978_v14  ;;  %v265_v14 = vadd.f32 %v884_v0, %v880_v63  ;;  %v245_v37 = vmul.f32 %v1065_v57, %v1065_v57  ;;  %v247_v45 = vmul.f32 %v1069_v9, %v1069_v9 }
  0x26   :  { %1618 = vst [vmem:[#allocation31_spill] sm:$0xff] %v1019_v61  ;;  %v218_v61 = vmul.f32 %v1028_v4, %v1028_v4  ;;  %186 = vadd.xlane.f32.xlu1 %v185_v13  ;;  %v224_v13 = vmul.f32 %v832_v38, %v832_v38  ;;  %v232_v39 = vmul.f32 %v996_v34, %v996_v34 }
  0x27   :  { %1619 = vst [vmem:[#allocation32_spill] sm:$0xff] %v1021_v35  ;;  %v168_v35 = vadd.f32 %v167_v22, %v1026_v2  ;;  %v1072_v22 = vadd.f32 %v87_v1, %v45_v59  ;;  %v280_v59 = vadd.f32 %v279_v19, %v876_v62  ;;  %v229_v1 = vmul.f32 %v974_v7, %v974_v7 }
  0x28   :  { %1620 = vst [vmem:[#allocation33_spill] sm:$0xff] %v1026_v2  ;;  %v260_v46 = vadd.f32 %v259_v29, %v218_v61  ;;  %v266_v63 = vadd.f32 %v265_v14, %v909_v17  ;;  %v241_v17 = vmul.f32 %v928_v28, %v928_v28  ;;  %v243_v14 = vmul.f32 %v942_v50, %v942_v50  ;;  %v1630_v50 = vld [vmem:[#allocation25_spill] sm:$0xff]  ;;  %v1631_v28 = vld [vmem:[#allocation26_spill] sm:$0xff] }
  0x29   :  { %v169_v2 = vadd.f32 %v168_v35, %v1028_v4  ;;  %v202_v35 = vadd.f32 %v1067_v6, %v1065_v57  ;;  %v220_v5 = vmul.f32 %v1072_v22, %v1072_v22  ;;  %1621 = vst [vmem:[#allocation34_spill] sm:$0xff] %v1094_v47  ;;  %v281_v19 = vadd.f32 %v280_v59, %v982_v15 }
  0x2a   :  { %1622 = vst [vmem:[#allocation35_spill] sm:$0xff] %v1096_v3  ;;  %v261_v60 = vadd.f32 %v260_v46, %v219_v40  ;;  %v273_v61 = vadd.f32 %v272_v54, %v229_v1  ;;  %v246_v15 = vmul.f32 %v1067_v6, %v1067_v6  ;;  %v225_v40 = vmul.f32 %v836_v43, %v836_v43 }
  0x2b   :  { %v170_v55 = vadd.f32 %v169_v2, %v1040_v42  ;;  %v203_v8 = vadd.f32 %v202_v35, %v1069_v9  ;;  %v230_v2 = vmul.f32 %v990_v21, %v990_v21  ;;  %v282_v29 = vadd.f32 %v281_v19, %v986_v16 }
  0x2c   :  { %v262_v20 = vadd.f32 %v261_v60, %v220_v5  ;;  %v248_v35 = vmul.f32 %v1084_v48, %v1084_v48  ;;  %v267_v59 = vadd.f32 %v266_v63, %v224_v13  ;;  %v239_v1 = vmul.f32 %v922_v25, %v922_v25  ;;  %v1628_v25 = vld [vmem:[#allocation17_spill] sm:$0xff] }
  0x2d   :  { %v171_v27 = vadd.f32 %v170_v55, %v1072_v22  ;;  %v204_v62 = vadd.f32 %v203_v8, %v1084_v48  ;;  %v274_v24 = vadd.f32 %v273_v61, %v230_v2  ;;  %v293_v55 = vadd.f32 %v246_v15, %v245_v37 }
  0x2e   :  { %263 = vadd.xlane.f32.xlu2 %v262_v20  ;;  %256 = vadd.xlane.f32.xlu1 %v255_v49  ;;  %v240_v46 = vmul.f32 %v924_v26, %v924_v26  ;;  %v283_v16 = vadd.f32 %v282_v29, %v1009_v52  ;;  %v226_v2 = vmul.f32 %v838_v44, %v838_v44  ;;  %v1633_v32 = vld [vmem:[#allocation32_spill] sm:$0xff] }
  0x2f   :  { %172 = vadd.xlane.f32.xlu0 %v171_v27  ;;  %v205_v53 = vadd.f32 %v204_v62, %v1094_v47  ;;  %v275_v5 = vadd.f32 %v274_v24, %v231_v58  ;;  %v294_v8 = vadd.f32 %v293_v55, %v247_v45  ;;  %v249_v49 = vmul.f32 %v1094_v47, %v1094_v47 }
  0x30   :  { %v286_v27 = vadd.f32 %v240_v46, %v239_v1  ;;  %v242_v54 = vmul.f32 %v938_v41, %v938_v41  ;;  %v268_v62 = vadd.f32 %v267_v59, %v225_v40  ;;  %v250_v61 = vmul.f32 %v1096_v3, %v1096_v3  ;;  %v413_v59 = vld [vmem:[%s1554_s3] sm:$0x3f]  ;;  %v1626_v41 = vld [vmem:[#allocation15_spill] sm:$0xff] }
  0x31   :  { %v206_v0 = vadd.f32 %v205_v53, %v1096_v3  ;;  %v276_v60 = vadd.f32 %v275_v5, %v232_v39  ;;  %v295_v19 = vadd.f32 %v294_v8, %v248_v35  ;;  %v244_v53 = vmul.f32 %v944_v51, %v944_v51  ;;  %v412_v35 = vld [vmem:[%s1553_s2] sm:$0x3f]  ;;  %s742_s2 = smov [#allocation5]  }
  0x32   :  { %v287_v58 = vadd.f32 %v286_v27, %v241_v17  ;;  %v269_v52 = vadd.f32 %v268_v62, %v226_v2  ;;  %v1156_v1 = vperm.slane %v412_v35, 0  ;;  %v1158_v46 = vperm.slane %v412_v35, 1  ;;  %s654_s3 = sshll.u32 %s742_s2, 4  ;;  %s655_s3 = int_to_ptr.vmem [resolvable:$true] %s654_s3 }
  0x33   :  { %v296_v13 = vadd.f32 %v295_v19, %v249_v49  ;;  %v1160_v8 = vperm.slane %v412_v35, 2  ;;  %v1170_v62 = vperm.slane %v412_v35, 5 }
  0x34   :  { %v288_v37 = vadd.f32 %v287_v58, %v242_v54 }
  0x35   :  { %v297_v20 = vadd.f32 %v296_v13, %v250_v61  ;;  %v1174_v61 = vperm.slane %v413_v59, 0  ;;  %v1178_v13 = vperm.slane %v413_v59, 2 }
  0x36   :  { %284 = vadd.xlane.f32.xlu2 %v283_v16  ;;  %277 = vadd.xlane.f32.xlu1 %v276_v60  ;;  %v289_v15 = vadd.f32 %v288_v37, %v243_v14  ;;  %v1164_v16 = vperm.slane %v412_v35, 3  ;;  %v1168_v60 = vperm.slane %v412_v35, 4 }
  0x37   :  { %207 = vadd.xlane.f32.xlu0 %v206_v0 }
  0x38   :  { %v290_v45 = vadd.f32 %v289_v15, %v244_v53  ;;  %v1184_v53 = vperm.slane %v413_v59, 4 }
  0x3e   :  { %298 = vadd.xlane.f32.xlu1 %v297_v20  ;;  %v1182_v20 = vperm.slane %v413_v59, 3 }
  0x3f   :  { %270 = vadd.xlane.f32.xlu0 %v269_v52  ;;  %v1176_v52 = vperm.slane %v413_v59, 1 }
  0x47   :  { %291 = vadd.xlane.f32.xlu0 %v290_v45  ;;  %v1186_v45 = vperm.slane %v413_v59, 5 }
  0x88   :  { %v194_v39 = vpop.xlane.xlu2 %193 }
  0x89   :  { %v1162_v27 = vmul.f32 0.0013020834, %v194_v39 }
  0x8d   :  { %v180_v24 = vpop.xlane.xlu1 %179 }
  0x8e   :  { %v1180_v37 = vmul.f32 0.0013020834, %v180_v24 }
  0x90   :  { %v166_v40 = vpop.xlane.xlu0 %165  ;;  %1623 = vst [vmem:[#allocation36_spill] sm:$0xff] %v1180_v37 }
  0x91   :  { %v1149_v55 = vmul.f32 0.0013020834, %v166_v40 }
  0x93   :  { %v314_v58 = vmul.f32 %v1149_v55, %v1149_v55 }
  0x95   :  { %v201_v63 = vpop.xlane.xlu2 %200 }
  0x96   :  { %v1214_v24 = vmul.f32 0.0013020834, %v201_v63 }
  0x98   :  { %1624 = vst [vmem:[#allocation37_spill] sm:$0xff] %v1214_v24  ;;  %v1242_v51 = vmul.f32 %v1214_v24, %v1214_v24 }
  0x99   :  { %v187_v0 = vpop.xlane.xlu1 %186 }
  0xa1   :  { %v264_v17 = vpop.xlane.xlu2 %263  ;;  %v257_v54 = vpop.xlane.xlu1 %256 }
  0xa2   :  { %v173_v29 = vpop.xlane.xlu0 %172  ;;  %v308_v2 = vmul.f32 0.0013020834, %v264_v17  ;;  %v307_v19 = vmul.f32 0.0013020834, %v257_v54  ;;  %v1192_v17 = vmul.f32 0.0013020834, %v187_v0 }
  0xa3   :  { %v1151_v5 = vmul.f32 0.0013020834, %v173_v29  ;;  %v318_v29 = vmul.f32 %v1162_v27, %v1162_v27 }
  0xa4   :  { %v321_v15 = vsub.f32 %v307_v19, %v314_v58  ;;  %v317_v58 = vmul.f32 %v1192_v17, %v1192_v17 }
  0xa5   :  { %v315_v49 = vmul.f32 %v1151_v5, %v1151_v5 }
  0xa7   :  { %v322_v14 = vsub.f32 %v308_v2, %v315_v49  ;;  %v328_v2 = vmax.f32 %v321_v15, 0.0  ;;  %v316_v15 = vmul.f32 %v1180_v37, %v1180_v37  ;;  %v421_v37 = vsub.f32 %v1633_v32, %v1151_v5 }
  0xa8   :  { %v425_v32 = vsub.f32 %v1072_v22, %v1151_v5 }
  0xa9   :  { %v329_v39 = vmax.f32 %v322_v14, 0.0  ;;  %v1206_v0 = vadd.f32 1e-05, %v328_v2  ;;  %v285_v14 = vpop.xlane.xlu2 %284  ;;  %v278_v59 = vpop.xlane.xlu1 %277  ;;  %v1625_v2 = vld [vmem:[#allocation14_spill] sm:$0xff] }
  0xaa   :  { %v208_v40 = vpop.xlane.xlu0 %207  ;;  %v311_v19 = vmul.f32 0.0013020834, %v285_v14  ;;  %v310_v35 = vmul.f32 0.0013020834, %v278_v59  ;;  %v1627_v59 = vld [vmem:[#allocation16_spill] sm:$0xff] }
  0xab   :  { %v1198_v54 = vadd.f32 1e-05, %v329_v39  ;;  %v1248_v43 = vmul.f32 0.0013020834, %v208_v40  ;;  %v1632_v40 = vld [vmem:[#allocation31_spill] sm:$0xff]  ;;  %vm348_vm2 = vweird.f32 %v1206_v0 }
  0xac   :  { %v325_v39 = vsub.f32 %v311_v19, %v318_v29  ;;  %v324_v49 = vsub.f32 %v310_v35, %v317_v58  ;;  %v1629_v29 = vld [vmem:[#allocation20_spill] sm:$0xff] }
  0xad   :  { %673 = vrsqrt.f32 %v1198_v54  ;;  %v320_v31 = vmul.f32 %v1248_v43, %v1248_v43  ;;  %vm358_vm1 = vweird.f32 %v1198_v54 }
  0xae   :  { %675 = vrsqrt.f32 %v1206_v0  ;;  %v332_v14 = vmax.f32 %v325_v39, 0.0  ;;  %v331_v26 = vmax.f32 %v324_v49, 0.0  ;;  %v420_v49 = vsub.f32 %v1632_v40, %v1151_v5 }
  0xaf   :  { %v423_v39 = vsub.f32 %v1028_v4, %v1151_v5 }
  0xb0   :  { %v1250_v63 = vadd.f32 1e-05, %v332_v14  ;;  %v1259_v44 = vadd.f32 1e-05, %v331_v26 }
  0xb1   :  { %v299_v19 = vpop.xlane.xlu1 %298 }
  0xb2   :  { %v271_v3 = vpop.xlane.xlu0 %270  ;;  %677 = vrsqrt.f32 %v1250_v63  ;;  %v313_v40 = vmul.f32 0.0013020834, %v299_v19  ;;  %vm388_vm7 = vweird.f32 %v1250_v63  ;;  %vm378_vm9 = vweird.f32 %v1259_v44 }
  0xb3   :  { %v309_v35 = vmul.f32 0.0013020834, %v271_v3  ;;  %v674_v58 = vpop.eup %673  ;;  %679 = vrsqrt.f32 %v1259_v44 }
  0xb4   :  { %v676_v24 = vpop.eup %675  ;;  %v353_v38 = vmul.f32 %v674_v58, %v1198_v54  ;;  %v327_v21 = vsub.f32 %v313_v40, %v320_v31  ;;  %vm359_vm0 = vweird.f32 %v674_v58 }
  0xb5   :  { %v323_v3 = vsub.f32 %v309_v35, %v316_v15  ;;  %v343_v14 = vmul.f32 %v676_v24, %v1206_v0  ;;  %v1634_v15 = vld [vmem:[#allocation33_spill] sm:$0xff]  ;;  %vm349_vm3 = vweird.f32 %v676_v24  ;;  %vm360_vm4 = vmor %vm358_vm1, %vm359_vm0  ;;  %v1635_v0 = vsub.f32 %v868_v56, %v1149_v55 }
  0xb6   :  { %v354_v33 = vmul.f32 %v674_v58, %v353_v38  ;;  %v422_v35 = vsub.f32 %v1634_v15, %v1151_v5  ;;  %v424_v38 = vsub.f32 %v1040_v42, %v1151_v5  ;;  %v334_v22 = vmax.f32 %v327_v21, 0.0  ;;  %vm350_vm6 = vmor %vm348_vm2, %vm349_vm3 }
  0xb7   :  { %v330_v26 = vmax.f32 %v323_v3, 0.0  ;;  %v344_v47 = vmul.f32 %v676_v24, %v343_v14 }
  0xb8   :  { %v355_v30 = vmul.f32 0.5, %v354_v33  ;;  %v1288_v7 = vpop.eup %677 }
  0xb9   :  { %v345_v34 = vmul.f32 0.5, %v344_v47  ;;  %v1280_v3 = vadd.f32 1e-05, %v330_v26  ;;  %v1293_v47 = vpop.eup %679  ;;  %vm389_vm5 = vweird.f32 %v1288_v7 }
  0xba   :  { %v292_v14 = vpop.xlane.xlu0 %291  ;;  %v356_v15 = vsub.f32 1.5, %v355_v30  ;;  %v383_v30 = vmul.f32 %v1288_v7, %v1250_v63  ;;  %vm379_vm8 = vweird.f32 %v1293_v47  ;;  %vm390_vm10 = vmor %vm388_vm7, %vm389_vm5  ;;  %v1642_v63 = vsub.f32 %v791_v11, %v1162_v27 }
  0xbb   :  { %v1286_v4 = vmul.f32 0.0013020834, %v292_v14  ;;  %v346_v42 = vsub.f32 1.5, %v345_v34  ;;  %681 = vrsqrt.f32 %v1280_v3  ;;  %v373_v14 = vmul.f32 %v1293_v47, %v1259_v44  ;;  %vm380_vm13 = vmor %vm378_vm9, %vm379_vm8 }
  0xbc   :  { %v357_v5 = vmul.f32 %v674_v58, %v356_v15  ;;  %v384_v40 = vmul.f32 %v1288_v7, %v383_v30  ;;  %v1307_v15 = vadd.f32 1e-05, %v334_v22  ;;  %vm368_vm12 = vweird.f32 %v1280_v3 }
  0xbd   :  { %v347_v26 = vmul.f32 %v676_v24, %v346_v42  ;;  %v326_v21 = vsub.f32 %v1286_v4, %v1242_v51 }
  0xbe   :  { %v361_v54 = vsel %vm360_vm4, %v674_v58, %v357_v5  ;;  %v385_v4 = vmul.f32 0.5, %v384_v40  ;;  %v1638_v40 = vsub.f32 %v1627_v59, %v1149_v55  ;;  %683 = vrsqrt.f32 %v1307_v15 }
  0xbf   :  { %v462_v31 = vmul.f32 %v420_v49, %v361_v54  ;;  %v463_v42 = vmul.f32 %v421_v37, %v361_v54  ;;  %v464_v33 = vmul.f32 %v422_v35, %v361_v54  ;;  %v465_v19 = vmul.f32 %v423_v39, %v361_v54 }
  0xc0   :  { %v466_v34 = vmul.f32 %v424_v38, %v361_v54  ;;  %v467_v51 = vmul.f32 %v425_v32, %v361_v54  ;;  %v351_v58 = vsel %vm350_vm6, %v676_v24, %v347_v26  ;;  %v1636_v24 = vsub.f32 %v1625_v2, %v1149_v55 }
  0xc1   :  { %v517_v5 = vmul.f32 %v1156_v1, %v462_v31  ;;  %v518_v30 = vmul.f32 %v1158_v46, %v463_v42  ;;  %v519_v22 = vmul.f32 %v1160_v8, %v464_v33  ;;  %v520_v37 = vmul.f32 %v1164_v16, %v465_v19  ;;  %v1326_v32 = vpop.eup %681 }
  0xc2   :  { %v521_v39 = vmul.f32 %v1168_v60, %v466_v34  ;;  %v522_v49 = vmul.f32 %v1170_v62, %v467_v51  ;;  %v456_v35 = vmul.f32 %v1635_v0, %v351_v58  ;;  %v457_v38 = vmul.f32 %v1636_v24, %v351_v58 }
  0xc3   :  { %v572_v33 = vadd.f32 %v1174_v61, %v517_v5  ;;  %v573_v19 = vadd.f32 %v1176_v52, %v518_v30  ;;  %v574_v31 = vadd.f32 %v1178_v13, %v519_v22  ;;  %v575_v26 = vadd.f32 %v1182_v20, %v520_v37 }
  0xc4   :  { %v576_v34 = vadd.f32 %v1184_v53, %v521_v39  ;;  %v577_v56 = vadd.f32 %v1186_v45, %v522_v49  ;;  %v1637_v2 = vsub.f32 %v1626_v41, %v1149_v55  ;;  %v459_v42 = vmul.f32 %v1638_v40, %v351_v58 }
  0xc5   :  { %614 = vst [vmem:[#allocation5 + $0x30] sm:$0xff] %v572_v33  ;;  %v1639_v51 = vsub.f32 %v1628_v25, %v1149_v55  ;;  %v1640_v30 = vsub.f32 %v1629_v29, %v1149_v55  ;;  %v511_v37 = vmul.f32 %v1156_v1, %v456_v35  ;;  %v512_v41 = vmul.f32 %v1158_v46, %v457_v38 }
  0xc6   :  { %v458_v54 = vmul.f32 %v1637_v2, %v351_v58  ;;  %615 = vst [vmem:[#allocation5 + $0x38] sm:$0xff] %v573_v19  ;;  %v514_v59 = vmul.f32 %v1164_v16, %v459_v42  ;;  %v386_v49 = vsub.f32 1.5, %v385_v4  ;;  %v374_v0 = vmul.f32 %v1293_v47, %v373_v14 }
  0xc7   :  { %v460_v5 = vmul.f32 %v1639_v51, %v351_v58  ;;  %v461_v22 = vmul.f32 %v1640_v30, %v351_v58  ;;  %616 = vst [vmem:[#allocation5 + $0x40] sm:$0xff] %v574_v31  ;;  %v566_v55 = vadd.f32 %v1174_v61, %v511_v37  ;;  %v1355_v29 = vmax.f32 %v326_v21, 0.0 }
  0xc8   :  { %v513_v39 = vmul.f32 %v1160_v8, %v458_v54  ;;  %617 = vst [vmem:[#allocation5 + $0x48] sm:$0xff] %v575_v26  ;;  %v567_v58 = vadd.f32 %v1176_v52, %v512_v41  ;;  %v387_v38 = vmul.f32 %v1288_v7, %v386_v49  ;;  %v375_v33 = vmul.f32 0.5, %v374_v0 }
  0xc9   :  { %v515_v25 = vmul.f32 %v1168_v60, %v460_v5  ;;  %v516_v24 = vmul.f32 %v1170_v62, %v461_v22  ;;  %618 = vst [vmem:[#allocation5 + $0x50] sm:$0xff] %v576_v34  ;;  %v569_v14 = vadd.f32 %v1182_v20, %v514_v59  ;;  %v363_v21 = vmul.f32 %v1326_v32, %v1280_v3  ;;  %v1662_v3 = vld [vmem:[#allocation10_spill] sm:$0xff] }
  0xca   :  { %v568_v35 = vadd.f32 %v1178_v13, %v513_v39  ;;  %619 = vst [vmem:[#allocation5 + $0x58] sm:$0xff] %v577_v56  ;;  %v391_v31 = vsel %vm390_vm10, %v1288_v7, %v387_v38  ;;  %v376_v26 = vsub.f32 1.5, %v375_v33  ;;  %vm369_vm11 = vweird.f32 %v1326_v32  ;;  %v1649_v33 = vld [vmem:[#allocation27_spill] sm:$0xff] }
  0xcb   :  { %v570_v4 = vadd.f32 %v1184_v53, %v515_v25  ;;  %v571_v19 = vadd.f32 %v1186_v45, %v516_v24  ;;  %608 = vst [vmem:[#allocation5] sm:$0xff] %v566_v55  ;;  %v1641_v34 = vsub.f32 %v789_v10, %v1162_v27  ;;  %v481_v54 = vmul.f32 %v1642_v63, %v391_v31  ;;  %v1408_v24 = vpop.eup %683  ;;  %v1655_v63 = vld [vmem:[#allocation30_spill] sm:$0xff]  ;;  %vm370_vm14 = vmor %vm368_vm12, %vm369_vm11 }
  0xcc   :  { %v1643_v40 = vsub.f32 %v793_v12, %v1162_v27  ;;  %v1644_v7 = vsub.f32 %v798_v18, %v1162_v27  ;;  %609 = vst [vmem:[#allocation5 + $0x8] sm:$0xff] %v567_v58  ;;  %v1645_v51 = vsub.f32 %v802_v23, %v1162_v27  ;;  %v1646_v10 = vsub.f32 %v829_v36, %v1162_v27 }
  0xcd   :  { %v480_v2 = vmul.f32 %v1641_v34, %v391_v31  ;;  %v377_v11 = vmul.f32 %v1293_v47, %v376_v26  ;;  %v364_v22 = vmul.f32 %v1326_v32, %v363_v21  ;;  %610 = vst [vmem:[#allocation5 + $0x10] sm:$0xff] %v568_v35  ;;  %v536_v18 = vmul.f32 %v1158_v46, %v481_v54  ;;  %v1651_v21 = vld [vmem:[#allocation28_spill] sm:$0xff]  ;;  %v1653_v26 = vld [vmem:[#allocation29_spill] sm:$0xff] }
  0xce   :  { %v482_v56 = vmul.f32 %v1643_v40, %v391_v31  ;;  %v483_v42 = vmul.f32 %v1644_v7, %v391_v31  ;;  %v484_v5 = vmul.f32 %v1645_v51, %v391_v31  ;;  %v485_v30 = vmul.f32 %v1646_v10, %v391_v31  ;;  %611 = vst [vmem:[#allocation5 + $0x18] sm:$0xff] %v569_v14 }
  0xcf   :  { %v535_v12 = vmul.f32 %v1156_v1, %v480_v2  ;;  %v381_v41 = vsel %vm380_vm13, %v1293_v47, %v377_v11  ;;  %v365_v39 = vmul.f32 0.5, %v364_v22  ;;  %612 = vst [vmem:[#allocation5 + $0x20] sm:$0xff] %v570_v4  ;;  %v591_v49 = vadd.f32 %v1176_v52, %v536_v18 }
  0xd0   :  { %v537_v37 = vmul.f32 %v1160_v8, %v482_v56  ;;  %v538_v23 = vmul.f32 %v1164_v16, %v483_v42  ;;  %v539_v36 = vmul.f32 %v1168_v60, %v484_v5  ;;  %v540_v27 = vmul.f32 %v1170_v62, %v485_v30  ;;  %613 = vst [vmem:[#allocation5 + $0x28] sm:$0xff] %v571_v19 }
  0xd1   :  { %v590_v59 = vadd.f32 %v1174_v61, %v535_v12  ;;  %v1647_v47 = vsub.f32 %v1630_v50, %v1192_v17  ;;  %v1648_v35 = vsub.f32 %v1631_v28, %v1192_v17  ;;  %v1650_v14 = vsub.f32 %v1649_v33, %v1192_v17  ;;  %633 = vst [vmem:[#allocation5 + $0xc8] sm:$0xff] %v591_v49 }
  0xd2   :  { %v592_v0 = vadd.f32 %v1178_v13, %v537_v37  ;;  %v593_v25 = vadd.f32 %v1182_v20, %v538_v23  ;;  %v594_v44 = vadd.f32 %v1184_v53, %v539_v36  ;;  %v595_v55 = vadd.f32 %v1186_v45, %v540_v27 }
  0xd3   :  { %v474_v58 = vmul.f32 %v1647_v47, %v381_v41  ;;  %v475_v38 = vmul.f32 %v1648_v35, %v381_v41  ;;  %632 = vst [vmem:[#allocation5 + $0xc0] sm:$0xff] %v590_v59  ;;  %v476_v4 = vmul.f32 %v1650_v14, %v381_v41  ;;  %v1652_v19 = vsub.f32 %v1651_v21, %v1192_v17  ;;  %v1658_v59 = vld [vmem:[#allocation36_spill] sm:$0xff] }
  0xd4   :  { %v1654_v34 = vsub.f32 %v1653_v26, %v1192_v17  ;;  %v1656_v50 = vsub.f32 %v1655_v63, %v1192_v17  ;;  %v366_v56 = vsub.f32 1.5, %v365_v39  ;;  %v403_v7 = vmul.f32 %v1408_v24, %v1307_v15  ;;  %634 = vst [vmem:[#allocation5 + $0xd0] sm:$0xff] %v592_v0  ;;  %v1657_v39 = vld [vmem:[#allocation8_spill] sm:$0xff] }
  0xd5   :  { %v477_v31 = vmul.f32 %v1652_v19, %v381_v41  ;;  %v529_v28 = vmul.f32 %v1156_v1, %v474_v58  ;;  %v530_v40 = vmul.f32 %v1158_v46, %v475_v38  ;;  %v531_v42 = vmul.f32 %v1160_v8, %v476_v4  ;;  %635 = vst [vmem:[#allocation5 + $0xd8] sm:$0xff] %v593_v25  ;;  %v1660_v25 = vld [vmem:[#allocation9_spill] sm:$0xff] }
  0xd6   :  { %v478_v2 = vmul.f32 %v1654_v34, %v381_v41  ;;  %v479_v54 = vmul.f32 %v1656_v50, %v381_v41  ;;  %v367_v11 = vmul.f32 %v1326_v32, %v366_v56  ;;  %v404_v22 = vmul.f32 %v1408_v24, %v403_v7  ;;  %636 = vst [vmem:[#allocation5 + $0xe0] sm:$0xff] %v594_v44  ;;  %v1668_v4 = vld [vmem:[#allocation13_spill] sm:$0xff] }
  0xd7   :  { %v532_v51 = vmul.f32 %v1164_v16, %v477_v31  ;;  %v584_v17 = vadd.f32 %v1174_v61, %v529_v28  ;;  %v585_v30 = vadd.f32 %v1176_v52, %v530_v40  ;;  %v586_v12 = vadd.f32 %v1178_v13, %v531_v42  ;;  %637 = vst [vmem:[#allocation5 + $0xe8] sm:$0xff] %v595_v55  ;;  %v1670_v42 = vld [vmem:[#allocation34_spill] sm:$0xff] }
  0xd8   :  { %v533_v5 = vmul.f32 %v1168_v60, %v478_v2  ;;  %v534_v10 = vmul.f32 %v1170_v62, %v479_v54  ;;  %v371_v36 = vsel %vm370_vm14, %v1326_v32, %v367_v11  ;;  %v405_v27 = vmul.f32 0.5, %v404_v22  ;;  %v1664_v32 = vld [vmem:[#allocation11_spill] sm:$0xff] }
  0xd9   :  { %v587_v18 = vadd.f32 %v1182_v20, %v532_v51  ;;  %vm409_vm15 = vweird.f32 %v1408_v24  ;;  %v1453_v41 = vadd.f32 1e-05, %v1355_v29  ;;  %626 = vst [vmem:[#allocation5 + $0x90] sm:$0xff] %v584_v17  ;;  %v1659_v49 = vsub.f32 %v1657_v39, %v1658_v59  ;;  %v1666_v29 = vld [vmem:[#allocation12_spill] sm:$0xff]  ;;  %v1671_v17 = vld [vmem:[#allocation35_spill] sm:$0xff] }
  0xda   :  { %v588_v37 = vadd.f32 %v1184_v53, %v533_v5  ;;  %v589_v23 = vadd.f32 %v1186_v45, %v534_v10  ;;  %v1661_v44 = vsub.f32 %v1660_v25, %v1658_v59  ;;  %v1663_v55 = vsub.f32 %v1662_v3, %v1658_v59  ;;  %627 = vst [vmem:[#allocation5 + $0x98] sm:$0xff] %v585_v30 }
  0xdb   :  { %v468_v0 = vmul.f32 %v1659_v49, %v371_v36  ;;  %v1665_v35 = vsub.f32 %v1664_v32, %v1658_v59  ;;  %v1667_v33 = vsub.f32 %v1666_v29, %v1658_v59  ;;  %v1669_v21 = vsub.f32 %v1668_v4, %v1658_v59  ;;  %628 = vst [vmem:[#allocation5 + $0xa0] sm:$0xff] %v586_v12  ;;  %v1677_v4 = vld [vmem:[#allocation18_spill] sm:$0xff] }
  0xdc   :  { %v469_v47 = vmul.f32 %v1661_v44, %v371_v36  ;;  %v470_v58 = vmul.f32 %v1663_v55, %v371_v36  ;;  %v406_v31 = vsub.f32 1.5, %v405_v27  ;;  %685 = vrsqrt.f32 %v1453_v41  ;;  %629 = vst [vmem:[#allocation5 + $0xa8] sm:$0xff] %v587_v18 }
  0xdd   :  { %v471_v38 = vmul.f32 %v1665_v35, %v371_v36  ;;  %v472_v14 = vmul.f32 %v1667_v33, %v371_v36  ;;  %v473_v19 = vmul.f32 %v1669_v21, %v371_v36  ;;  %v523_v26 = vmul.f32 %v1156_v1, %v468_v0  ;;  %630 = vst [vmem:[#allocation5 + $0xb0] sm:$0xff] %v588_v37 }
  0xde   :  { %v524_v34 = vmul.f32 %v1158_v46, %v469_v47  ;;  %v525_v2 = vmul.f32 %v1160_v8, %v470_v58  ;;  %v407_v28 = vmul.f32 %v1408_v24, %v406_v31  ;;  %vm408_vm0 = vweird.f32 %v1307_v15  ;;  %631 = vst [vmem:[#allocation5 + $0xb8] sm:$0xff] %v589_v23 }
  0xdf   :  { %v526_v63 = vmul.f32 %v1164_v16, %v471_v38  ;;  %v527_v50 = vmul.f32 %v1168_v60, %v472_v14  ;;  %v528_v54 = vmul.f32 %v1170_v62, %v473_v19  ;;  %v578_v40 = vadd.f32 %v1174_v61, %v523_v26  ;;  %vm410_vm1 = vmor %vm408_vm0, %vm409_vm15  ;;  %v1676_v14 = vld [vmem:[#allocation37_spill] sm:$0xff]  ;;  %v1678_v19 = vld [vmem:[#allocation19_spill] sm:$0xff] }
  0xe0   :  { %v579_v56 = vadd.f32 %v1176_v52, %v524_v34  ;;  %v580_v7 = vadd.f32 %v1178_v13, %v525_v2  ;;  %v454_v51 = vsub.f32 %v1670_v42, %v1248_v43  ;;  %v411_v15 = vsel %vm410_vm1, %v1408_v24, %v407_v28  ;;  %v1679_v26 = vld [vmem:[#allocation21_spill] sm:$0xff]  ;;  %v1680_v2 = vld [vmem:[#allocation22_spill] sm:$0xff]  ;;  %v1682_v28 = vld [vmem:[#allocation24_spill] sm:$0xff] }
  0xe1   :  { %v581_v5 = vadd.f32 %v1182_v20, %v526_v63  ;;  %v582_v10 = vadd.f32 %v1184_v53, %v527_v50  ;;  %v455_v30 = vsub.f32 %v1671_v17, %v1248_v43  ;;  %620 = vst [vmem:[#allocation5 + $0x60] sm:$0xff] %v578_v40  ;;  %v1672_v11 = vsub.f32 %v1065_v57, %v1248_v43  ;;  %v1681_v50 = vld [vmem:[#allocation23_spill] sm:$0xff] }
  0xe2   :  { %v1673_v12 = vsub.f32 %v1067_v6, %v1248_v43  ;;  %v1674_v37 = vsub.f32 %v1069_v9, %v1248_v43  ;;  %v1675_v36 = vsub.f32 %v1084_v48, %v1248_v43  ;;  %v686_v27 = vpop.eup %685  ;;  %v583_v39 = vadd.f32 %v1186_v45, %v528_v54  ;;  %621 = vst [vmem:[#allocation5 + $0x68] sm:$0xff] %v579_v56 }
  0xe3   :  { %v492_v22 = vmul.f32 %v1672_v11, %v411_v15  ;;  %v496_v59 = vmul.f32 %v454_v51, %v411_v15  ;;  %v497_v49 = vmul.f32 %v455_v30, %v411_v15  ;;  %622 = vst [vmem:[#allocation5 + $0x70] sm:$0xff] %v580_v7  ;;  %v393_v48 = vmul.f32 %v686_v27, %v1453_v41 }
  0xe4   :  { %v493_v18 = vmul.f32 %v1673_v12, %v411_v15  ;;  %v494_v23 = vmul.f32 %v1674_v37, %v411_v15  ;;  %v495_v24 = vmul.f32 %v1675_v36, %v411_v15  ;;  %623 = vst [vmem:[#allocation5 + $0x78] sm:$0xff] %v581_v5  ;;  %vm399_vm2 = vweird.f32 %v686_v27 }
  0xe5   :  { %v547_v57 = vmul.f32 %v1156_v1, %v492_v22  ;;  %v551_v25 = vmul.f32 %v1168_v60, %v496_v59  ;;  %v552_v43 = vmul.f32 %v1170_v62, %v497_v49  ;;  %624 = vst [vmem:[#allocation5 + $0x80] sm:$0xff] %v582_v10  ;;  %v394_v58 = vmul.f32 %v686_v27, %v393_v48 }
  0xe6   :  { %v548_v6 = vmul.f32 %v1158_v46, %v493_v18  ;;  %v549_v0 = vmul.f32 %v1160_v8, %v494_v23  ;;  %v550_v9 = vmul.f32 %v1164_v16, %v495_v24  ;;  %625 = vst [vmem:[#allocation5 + $0x88] sm:$0xff] %v583_v39  ;;  %vm398_vm3 = vweird.f32 %v1453_v41 }
  0xe7   :  { %v602_v44 = vadd.f32 %v1174_v61, %v547_v57  ;;  %v606_v32 = vadd.f32 %v1184_v53, %v551_v25  ;;  %v607_v35 = vadd.f32 %v1186_v45, %v552_v43  ;;  %v395_v38 = vmul.f32 0.5, %v394_v58  ;;  %vm400_vm4 = vmor %vm398_vm3, %vm399_vm2 }
  0xe8   :  { %v603_v47 = vadd.f32 %v1176_v52, %v548_v6  ;;  %v604_v3 = vadd.f32 %v1178_v13, %v549_v0  ;;  %v605_v55 = vadd.f32 %v1182_v20, %v550_v9  ;;  %v444_v21 = vsub.f32 %v1677_v4, %v1676_v14 }
  0xe9   :  { %644 = vst [vmem:[#allocation5 + $0x120] sm:$0xff] %v602_v44  ;;  %v396_v29 = vsub.f32 1.5, %v395_v38  ;;  %v445_v31 = vsub.f32 %v1678_v19, %v1676_v14  ;;  %v446_v34 = vsub.f32 %v1679_v26, %v1676_v14  ;;  %v447_v63 = vsub.f32 %v1680_v2, %v1676_v14 }
  0xea   :  { %645 = vst [vmem:[#allocation5 + $0x128] sm:$0xff] %v603_v47  ;;  %v448_v54 = vsub.f32 %v1681_v50, %v1676_v14  ;;  %v449_v40 = vsub.f32 %v1682_v28, %v1676_v14 }
  0xeb   :  { %646 = vst [vmem:[#allocation5 + $0x130] sm:$0xff] %v604_v3  ;;  %v397_v33 = vmul.f32 %v686_v27, %v396_v29 }
  0xec   :  { %647 = vst [vmem:[#allocation5 + $0x138] sm:$0xff] %v605_v55 }
  0xed   :  { %648 = vst [vmem:[#allocation5 + $0x140] sm:$0xff] %v606_v32  ;;  %v401_v41 = vsel %vm400_vm4, %v686_v27, %v397_v33 }
  0xee   :  { %649 = vst [vmem:[#allocation5 + $0x148] sm:$0xff] %v607_v35  ;;  %v486_v56 = vmul.f32 %v444_v21, %v401_v41  ;;  %v487_v7 = vmul.f32 %v445_v31, %v401_v41  ;;  %v488_v42 = vmul.f32 %v446_v34, %v401_v41  ;;  %v489_v51 = vmul.f32 %v447_v63, %v401_v41 }
  0xef   :  { %v490_v5 = vmul.f32 %v448_v54, %v401_v41  ;;  %v491_v10 = vmul.f32 %v449_v40, %v401_v41 }
  0xf0   :  { %v541_v15 = vmul.f32 %v1156_v1, %v486_v56  ;;  %v542_v17 = vmul.f32 %v1158_v46, %v487_v7  ;;  %v543_v30 = vmul.f32 %v1160_v8, %v488_v42  ;;  %v544_v11 = vmul.f32 %v1164_v16, %v489_v51 }
  0xf1   :  { %v545_v22 = vmul.f32 %v1168_v60, %v490_v5  ;;  %v546_v12 = vmul.f32 %v1170_v62, %v491_v10 }
  0xf2   :  { %v596_v18 = vadd.f32 %v1174_v61, %v541_v15  ;;  %v597_v37 = vadd.f32 %v1176_v52, %v542_v17  ;;  %v598_v23 = vadd.f32 %v1178_v13, %v543_v30  ;;  %v599_v36 = vadd.f32 %v1182_v20, %v544_v11 }
  0xf3   :  { %v600_v1 = vadd.f32 %v1184_v53, %v545_v22  ;;  %v601_v46 = vadd.f32 %v1186_v45, %v546_v12 }
  0xf4   :  { %638 = vst [vmem:[#allocation5 + $0xf0] sm:$0xff] %v596_v18 }
  0xf5   :  { %639 = vst [vmem:[#allocation5 + $0xf8] sm:$0xff] %v597_v37 }
  0xf6   :  { %640 = vst [vmem:[#allocation5 + $0x100] sm:$0xff] %v598_v23 }
  0xf7   :  { %641 = vst [vmem:[#allocation5 + $0x108] sm:$0xff] %v599_v36 }
  0xf8   :  { %642 = vst [vmem:[#allocation5 + $0x110] sm:$0xff] %v600_v1 }
  0xf9   :  { %643 = vst [vmem:[#allocation5 + $0x118] sm:$0xff] %v601_v46 }
  0xfa   :  { %662 = dma.vmem_to_hbm [thread:$0]  %s655_s3, 5376, %s657_s9, [#allocation4], %s740_s20, %s740_s20, %s741_s21  }
  0xfb   :  { %737 = dma.done.wait [#allocation4], 5376  }
  0xfc   :  { %738 = vsyncadd [#allocation4], 4294961920 }
  0xfd   :  { %667 = vsyncpa [#allocation3], 1 }
  0xfe   :  { %668 = vsyncpa [#allocation4], 1 }

</bundles_post_ra>
